<compile_context>
chip_gen: v6e
topology: v6e:2x2x1
jax: 0.10.0
libtpu: 0.0.40
codegen_flags: <defaults>
</compile_context>

<pallas_src>
import functools

import jax
import jax.numpy as jnp
from jax.experimental import pallas as pl
from jax.experimental.pallas import tpu as pltpu


def char_rnn1_seq_kernel(xg_ref, h0_ref, w_hh_ref, b_hh_ref, w_ho_ref, b_ho_ref,
                         dr_ref, out_ref, h_ref, *, batch):
    """One GRU time step per grid iteration; hidden state carried in h_ref."""
    t = pl.program_id(0)

    @pl.when(t == 0)
    def _init():
        h_ref[...] = h0_ref[...]

    h = h_ref[...]                                            # (Bp, H)

    # Recurrent gate pre-activations, one pre-transposed (H, H) slab per gate.
    gh_r = jnp.dot(h, w_hh_ref[0], preferred_element_type=jnp.float32) + b_hh_ref[0]
    gh_z = jnp.dot(h, w_hh_ref[1], preferred_element_type=jnp.float32) + b_hh_ref[1]
    gh_n = jnp.dot(h, w_hh_ref[2], preferred_element_type=jnp.float32) + b_hh_ref[2]

    # Input-side pre-activations (W_i? x + b_i?) were precomputed as a (V, 3, H)
    # table and gathered for the whole sequence in the wrapper; xg_ref is (3, Bp, H).
    r = jax.nn.sigmoid(xg_ref[0] + gh_r)
    z = jax.nn.sigmoid(xg_ref[1] + gh_z)
    n = jnp.tanh(xg_ref[2] + r * gh_n)
    h_new = (1.0 - z) * n + z * h                             # (Bp, H)

    # h2o + softmax (legacy F.softmax on 2D == axis=-1).
    logits = jnp.dot(h_new, w_ho_ref[...],
                     preferred_element_type=jnp.float32) + b_ho_ref[...]
    logits = logits - jnp.max(logits, axis=-1, keepdims=True)
    e = jnp.exp(logits)
    sm = e * pl.reciprocal(jnp.sum(e, axis=-1, keepdims=True), approx=True)

    # torch.cat((out1, dr_data), 0): rows < batch take the softmax, the remaining
    # rows take dr_data. Full-tile select -> no unaligned concat / partial store.
    row_ids = jax.lax.broadcasted_iota(jnp.int32, out_ref.shape, 0)
    out_ref[...] = jnp.where(row_ids < batch, sm, dr_ref[...])

    h_ref[...] = h_new


def pack_params(params):
    """One-time repack: fold embed*W_ih into a gather table, pre-transpose weights."""
    H = params["w_hh"].shape[1]
    table = params["embed"] @ params["w_ih"].T + params["b_ih"][None, :]   # (V, 3H)
    return {
        "x_gate_table": table.reshape(-1, 3, H),                           # (V, 3, H)
        "w_hh_t": jnp.transpose(params["w_hh"].reshape(3, H, H), (0, 2, 1)),  # (3, H, H)
        "b_hh": params["b_hh"].reshape(3, 1, H),                           # (3, 1, H)
        "w_ho_t": params["w_ho"].T,                                        # (H, O)
        "b_ho": params["b_ho"].reshape(1, -1),                             # (1, O)
    }


def char_rnn1_forward(indices_seq, hidden, dr_data, packed):
    """Applies CharRNN1.forward over a sequence (T, B) inside one Pallas kernel."""
    T, B = indices_seq.shape
    R, O = dr_data.shape
    H = packed["w_hh_t"].shape[-1]
    Bp = B + R  # rows of the concatenated output slab; extra rows ride in sublane padding

    # Gather input-gate pre-activations for the whole sequence once (tiny XLA op,
    # outside the recurrent loop). Dummy rows (index 0) only feed padding lanes.
    idx_pad = jnp.concatenate(
        [indices_seq, jnp.zeros((T, R), indices_seq.dtype)], axis=1)        # (T, Bp)
    x_gates = jnp.transpose(packed["x_gate_table"][idx_pad], (0, 2, 1, 3))  # (T, 3, Bp, H)

    h0_pad = jnp.concatenate([hidden[0], jnp.zeros((R, H), hidden.dtype)], axis=0)  # (Bp, H)
    dr_pad = jnp.concatenate([jnp.zeros((B, O), dr_data.dtype), dr_data], axis=0)   # (Bp, O)

    kernel = functools.partial(char_rnn1_seq_kernel, batch=B)

    out, h_last = pl.pallas_call(
        kernel,
        out_shape=(jax.ShapeDtypeStruct((T, Bp, O), jnp.float32),
                   jax.ShapeDtypeStruct((Bp, H), jnp.float32)),
        grid=(T,),
        in_specs=[
            pl.BlockSpec((None, 3, Bp, H), lambda t: (t, 0, 0, 0)),  # per-step x gates
            pl.BlockSpec((Bp, H), lambda t: (0, 0)),                 # h0 (resident)
            pl.BlockSpec((3, H, H), lambda t: (0, 0, 0)),            # W_hh^T slabs (resident)
            pl.BlockSpec((3, 1, H), lambda t: (0, 0, 0)),            # b_hh (resident)
            pl.BlockSpec((H, O), lambda t: (0, 0)),                  # W_ho^T (resident)
            pl.BlockSpec((1, O), lambda t: (0, 0)),                  # b_ho (resident)
            pl.BlockSpec((Bp, O), lambda t: (0, 0)),                 # dr rows (resident)
        ],
        out_specs=(
            pl.BlockSpec((None, Bp, O), lambda t: (t, 0, 0)),        # per-step output slab
            pl.BlockSpec((Bp, H), lambda t: (0, 0)),                 # resident hidden carry
        ),
        compiler_params=pltpu.CompilerParams(dimension_semantics=("arbitrary",)),
    )(x_gates, h0_pad, packed["w_hh_t"], packed["b_hh"],
      packed["w_ho_t"], packed["b_ho"], dr_pad)

    hidden_new = h_last[:B][None]  # (n_layers=1, B, H)
    return out, hidden_new


def init_params(key, input_size, hidden_size, output_size):
    """PyTorch-style default init (Embedding: N(0,1); GRU/Linear: U(-1/sqrt(H)))."""
    ks = jax.random.split(key, 7)
    H, V, O = hidden_size, input_size, output_size
    s = 1.0 / jnp.sqrt(H)
    return {
        "embed": jax.random.normal(ks[0], (V, H), jnp.float32),
        "w_ih": jax.random.uniform(ks[1], (3 * H, H), jnp.float32, -s, s),
        "w_hh": jax.random.uniform(ks[2], (3 * H, H), jnp.float32, -s, s),
        "b_ih": jax.random.uniform(ks[3], (3 * H,), jnp.float32, -s, s),
        "b_hh": jax.random.uniform(ks[4], (3 * H,), jnp.float32, -s, s),
        "w_ho": jax.random.uniform(ks[5], (O, H), jnp.float32, -s, s),
        "b_ho": jax.random.uniform(ks[6], (O,), jnp.float32, -s, s),
    }


def reference_forward(indices_seq, hidden, dr_data, params):
    """Pure-JAX reference: PyTorch CharRNN1.forward applied step-by-step."""
    H = params["w_hh"].shape[1]
    h = hidden[0]
    outs = []
    for t in range(indices_seq.shape[0]):
        x = params["embed"][indices_seq[t]]                       # (B, H)
        gx = x @ params["w_ih"].T + params["b_ih"]
        gh = h @ params["w_hh"].T + params["b_hh"]
        r = jax.nn.sigmoid(gx[:, :H] + gh[:, :H])
        z = jax.nn.sigmoid(gx[:, H:2 * H] + gh[:, H:2 * H])
        n = jnp.tanh(gx[:, 2 * H:] + r * gh[:, 2 * H:])
        h = (1.0 - z) * n + z * h
        logits = h @ params["w_ho"].T + params["b_ho"]
        sm = jax.nn.softmax(logits, axis=-1)
        outs.append(jnp.concatenate([sm, dr_data], axis=0))
    return jnp.stack(outs, axis=0), h[None]


if __name__ == "__main__":
    # Small shapes consistent with the module: vocab=12 (alphabet_size), hidden=32,
    # batch=2, n_layers=1, dr_data has output_size columns; sequence length 8.
    input_size = 12
    hidden_size = 32
    output_size = 12
    batch = 2
    n_layers = 1
    dr_rows = 3
    seq_len = 8

    key = jax.random.PRNGKey(0)
    kp, ki, kd = jax.random.split(key, 3)

    params = init_params(kp, input_size, hidden_size, output_size)
    packed = pack_params(params)

    indices = jax.random.randint(ki, (seq_len, batch), 0, input_size, dtype=jnp.int32)
    hidden = jnp.zeros((n_layers, batch, hidden_size), jnp.float32)  # init_hidden
    dr_data = jax.random.normal(kd, (dr_rows, output_size), jnp.float32)

    fwd = jax.jit(char_rnn1_forward)
    output, hidden_new = fwd(indices, hidden, dr_data, packed)
    jax.block_until_ready((output, hidden_new))

    ref_out, ref_hidden = reference_forward(indices, hidden, dr_data, params)

    assert output.shape == (seq_len, batch + dr_rows, output_size)
    assert hidden_new.shape == (n_layers, batch, hidden_size)
    # softmax rows sum to 1; dr rows passed through; matches the pure-JAX reference
    assert bool(jnp.allclose(jnp.sum(output[:, :batch, :], axis=-1), 1.0, atol=5e-3))
    assert bool(jnp.allclose(output[:, batch:, :], dr_data, atol=1e-6))
    assert bool(jnp.allclose(output, ref_out, atol=5e-3, rtol=5e-3))
    assert bool(jnp.allclose(hidden_new, ref_hidden, atol=1e-4, rtol=1e-4))

    print("KERNEL_OK")
</pallas_src>

<mosaic_0001>
module attributes {stable_mosaic.version = 11 : i64} {
  func.func @char_rnn1_seq_kernel(%arg0: i32, %arg1: memref<1x3x5x32xf32, #tpu.memory_space<vmem>>, %arg2: memref<5x32xf32, #tpu.memory_space<vmem>>, %arg3: memref<3x32x32xf32, #tpu.memory_space<vmem>>, %arg4: memref<3x1x32xf32, #tpu.memory_space<vmem>>, %arg5: memref<32x12xf32, #tpu.memory_space<vmem>>, %arg6: memref<1x12xf32, #tpu.memory_space<vmem>>, %arg7: memref<5x12xf32, #tpu.memory_space<vmem>>, %arg8: memref<1x5x12xf32, #tpu.memory_space<vmem>>, %arg9: memref<5x32xf32, #tpu.memory_space<vmem>>) attributes {dimension_semantics = [#tpu.dimension_semantics<arbitrary>], iteration_bounds = array<i64: 8>, scalar_prefetch = 0 : i64, scratch_operands = 0 : i64, tpu.core_type = #tpu.core_type<tc>, window_params = [{transform_indices = @transform_0, window_bounds = array<i64: 1, 3, 5, 32>}, {pipeline_mode = #tpu.pipeline_mode<synchronous>, transform_indices = @transform_1, window_bounds = array<i64: 5, 32>}, {pipeline_mode = #tpu.pipeline_mode<synchronous>, transform_indices = @transform_2, window_bounds = array<i64: 3, 32, 32>}, {pipeline_mode = #tpu.pipeline_mode<synchronous>, transform_indices = @transform_3, window_bounds = array<i64: 3, 1, 32>}, {pipeline_mode = #tpu.pipeline_mode<synchronous>, transform_indices = @transform_4, window_bounds = array<i64: 32, 12>}, {pipeline_mode = #tpu.pipeline_mode<synchronous>, transform_indices = @transform_5, window_bounds = array<i64: 1, 12>}, {pipeline_mode = #tpu.pipeline_mode<synchronous>, transform_indices = @transform_6, window_bounds = array<i64: 5, 12>}, {transform_indices = @transform_7, window_bounds = array<i64: 1, 5, 12>}, {pipeline_mode = #tpu.pipeline_mode<synchronous>, transform_indices = @transform_8, window_bounds = array<i64: 5, 32>}]} {
    %c0_i32 = arith.constant 0 : i32
    %0 = arith.cmpi eq, %arg0, %c0_i32 : i32
    %1 = arith.extui %0 : i1 to i32
    %c0_i32_0 = arith.constant 0 : i32
    %2 = arith.cmpi ne, %1, %c0_i32_0 : i32
    scf.if %2 {
      %c0_49 = arith.constant 0 : index
      %c0_50 = arith.constant 0 : index
      %75 = vector.load %arg2[%c0_49, %c0_50] : memref<5x32xf32, #tpu.memory_space<vmem>>, vector<5x32xf32>
      %c0_51 = arith.constant 0 : index
      %c0_52 = arith.constant 0 : index
      %76 = vector.load %arg9[%c0_51, %c0_52] : memref<5x32xf32, #tpu.memory_space<vmem>>, vector<5x32xf32>
      tpu.vector_store %arg9[%c0_51, %c0_52], %75 {strides = array<i32>} : memref<5x32xf32, #tpu.memory_space<vmem>>, vector<5x32xf32>,
    } else {
    }
    %c0 = arith.constant 0 : index
    %c0_1 = arith.constant 0 : index
    %3 = vector.load %arg9[%c0, %c0_1] : memref<5x32xf32, #tpu.memory_space<vmem>>, vector<5x32xf32>
    %c0_2 = arith.constant 0 : index
    %c0_3 = arith.constant 0 : index
    %c0_4 = arith.constant 0 : index
    %4 = vector.load %arg3[%c0_2, %c0_3, %c0_4] : memref<3x32x32xf32, #tpu.memory_space<vmem>>, vector<1x32x32xf32>
    %5 = vector.shape_cast %4 : vector<1x32x32xf32> to vector<32x32xf32>
    %cst = arith.constant dense<0.000000e+00> : vector<5x32xf32>
    %6 = tpu.matmul %3, %5, %cst {dimension_numbers = #tpu.dot_dimension_numbers<[1], [0], [0], [1], [0, 0, 1, 1], [], []>} : vector<5x32xf32>, vector<32x32xf32>, vector<5x32xf32> -> vector<5x32xf32>
    %c0_5 = arith.constant 0 : index
    %c0_6 = arith.constant 0 : index
    %c0_7 = arith.constant 0 : index
    %7 = vector.load %arg4[%c0_5, %c0_6, %c0_7] : memref<3x1x32xf32, #tpu.memory_space<vmem>>, vector<1x1x32xf32>
    %8 = vector.shape_cast %7 : vector<1x1x32xf32> to vector<1x32xf32>
    %9 = vector.broadcast %8 : vector<1x32xf32> to vector<5x32xf32>
    %10 = arith.addf %6, %9 : vector<5x32xf32>
    %c1 = arith.constant 1 : index
    %c0_8 = arith.constant 0 : index
    %c0_9 = arith.constant 0 : index
    %11 = vector.load %arg3[%c1, %c0_8, %c0_9] : memref<3x32x32xf32, #tpu.memory_space<vmem>>, vector<1x32x32xf32>
    %12 = vector.shape_cast %11 : vector<1x32x32xf32> to vector<32x32xf32>
    %cst_10 = arith.constant dense<0.000000e+00> : vector<5x32xf32>
    %13 = tpu.matmul %3, %12, %cst_10 {dimension_numbers = #tpu.dot_dimension_numbers<[1], [0], [0], [1], [0, 0, 1, 1], [], []>} : vector<5x32xf32>, vector<32x32xf32>, vector<5x32xf32> -> vector<5x32xf32>
    %c1_11 = arith.constant 1 : index
    %c0_12 = arith.constant 0 : index
    %c0_13 = arith.constant 0 : index
    %14 = vector.load %arg4[%c1_11, %c0_12, %c0_13] : memref<3x1x32xf32, #tpu.memory_space<vmem>>, vector<1x1x32xf32>
    %15 = vector.shape_cast %14 : vector<1x1x32xf32> to vector<1x32xf32>
    %16 = vector.broadcast %15 : vector<1x32xf32> to vector<5x32xf32>
    %17 = arith.addf %13, %16 : vector<5x32xf32>
    %c2 = arith.constant 2 : index
    %c0_14 = arith.constant 0 : index
    %c0_15 = arith.constant 0 : index
    %18 = vector.load %arg3[%c2, %c0_14, %c0_15] : memref<3x32x32xf32, #tpu.memory_space<vmem>>, vector<1x32x32xf32>
    %19 = vector.shape_cast %18 : vector<1x32x32xf32> to vector<32x32xf32>
    %cst_16 = arith.constant dense<0.000000e+00> : vector<5x32xf32>
    %20 = tpu.matmul %3, %19, %cst_16 {dimension_numbers = #tpu.dot_dimension_numbers<[1], [0], [0], [1], [0, 0, 1, 1], [], []>} : vector<5x32xf32>, vector<32x32xf32>, vector<5x32xf32> -> vector<5x32xf32>
    %c2_17 = arith.constant 2 : index
    %c0_18 = arith.constant 0 : index
    %c0_19 = arith.constant 0 : index
    %21 = vector.load %arg4[%c2_17, %c0_18, %c0_19] : memref<3x1x32xf32, #tpu.memory_space<vmem>>, vector<1x1x32xf32>
    %22 = vector.shape_cast %21 : vector<1x1x32xf32> to vector<1x32xf32>
    %23 = vector.broadcast %22 : vector<1x32xf32> to vector<5x32xf32>
    %24 = arith.addf %20, %23 : vector<5x32xf32>
    %c0_20 = arith.constant 0 : index
    %c0_21 = arith.constant 0 : index
    %c0_22 = arith.constant 0 : index
    %c0_23 = arith.constant 0 : index
    %25 = vector.load %arg1[%c0_20, %c0_21, %c0_22, %c0_23] : memref<1x3x5x32xf32, #tpu.memory_space<vmem>>, vector<1x1x5x32xf32>
    %26 = vector.shape_cast %25 : vector<1x1x5x32xf32> to vector<5x32xf32>
    %27 = arith.addf %26, %10 : vector<5x32xf32>
    %28 = arith.negf %27 : vector<5x32xf32>
    %29 = math.exp %28 : vector<5x32xf32>
    %cst_24 = arith.constant 1.000000e+00 : f32
    %30 = vector.broadcast %cst_24 : f32 to vector<5x32xf32>
    %31 = arith.addf %30, %29 : vector<5x32xf32>
    %32 = arith.divf %30, %31 : vector<5x32xf32>
    %c0_25 = arith.constant 0 : index
    %c1_26 = arith.constant 1 : index
    %c0_27 = arith.constant 0 : index
    %c0_28 = arith.constant 0 : index
    %33 = vector.load %arg1[%c0_25, %c1_26, %c0_27, %c0_28] : memref<1x3x5x32xf32, #tpu.memory_space<vmem>>, vector<1x1x5x32xf32>
    %34 = vector.shape_cast %33 : vector<1x1x5x32xf32> to vector<5x32xf32>
    %35 = arith.addf %34, %17 : vector<5x32xf32>
    %36 = arith.negf %35 : vector<5x32xf32>
    %37 = math.exp %36 : vector<5x32xf32>
    %cst_29 = arith.constant 1.000000e+00 : f32
    %38 = vector.broadcast %cst_29 : f32 to vector<5x32xf32>
    %39 = arith.addf %38, %37 : vector<5x32xf32>
    %40 = arith.divf %38, %39 : vector<5x32xf32>
    %c0_30 = arith.constant 0 : index
    %c2_31 = arith.constant 2 : index
    %c0_32 = arith.constant 0 : index
    %c0_33 = arith.constant 0 : index
    %41 = vector.load %arg1[%c0_30, %c2_31, %c0_32, %c0_33] : memref<1x3x5x32xf32, #tpu.memory_space<vmem>>, vector<1x1x5x32xf32>
    %42 = vector.shape_cast %41 : vector<1x1x5x32xf32> to vector<5x32xf32>
    %43 = arith.mulf %32, %24 : vector<5x32xf32>
    %44 = arith.addf %42, %43 : vector<5x32xf32>
    %45 = math.tanh %44 : vector<5x32xf32>
    %cst_34 = arith.constant 1.000000e+00 : f32
    %46 = vector.broadcast %cst_34 : f32 to vector<5x32xf32>
    %47 = arith.subf %46, %40 : vector<5x32xf32>
    %48 = arith.mulf %47, %45 : vector<5x32xf32>
    %49 = arith.mulf %40, %3 : vector<5x32xf32>
    %50 = arith.addf %48, %49 : vector<5x32xf32>
    %c0_35 = arith.constant 0 : index
    %c0_36 = arith.constant 0 : index
    %51 = vector.load %arg5[%c0_35, %c0_36] : memref<32x12xf32, #tpu.memory_space<vmem>>, vector<32x12xf32>
    %cst_37 = arith.constant dense<0.000000e+00> : vector<5x12xf32>
    %52 = tpu.matmul %50, %51, %cst_37 {dimension_numbers = #tpu.dot_dimension_numbers<[1], [0], [0], [1], [0, 0, 1, 1], [], []>} : vector<5x32xf32>, vector<32x12xf32>, vector<5x12xf32> -> vector<5x12xf32>
    %c0_38 = arith.constant 0 : index
    %c0_39 = arith.constant 0 : index
    %53 = vector.load %arg6[%c0_38, %c0_39] : memref<1x12xf32, #tpu.memory_space<vmem>>, vector<1x12xf32>
    %54 = vector.broadcast %53 : vector<1x12xf32> to vector<5x12xf32>
    %55 = arith.addf %52, %54 : vector<5x12xf32>
    %cst_40 = arith.constant dense<0xFF800000> : vector<5xf32>
    %56 = vector.multi_reduction <maximumf>, %55, %cst_40 [1] : vector<5x12xf32> to vector<5xf32>
    %57 = vector.shape_cast %56 : vector<5xf32> to vector<5x1xf32>
    %58 = vector.broadcast %57 : vector<5x1xf32> to vector<5x12xf32>
    %59 = arith.subf %55, %58 : vector<5x12xf32>
    %60 = math.exp %59 : vector<5x12xf32>
    %cst_41 = arith.constant dense<0.000000e+00> : vector<5xf32>
    %61 = vector.multi_reduction <add>, %60, %cst_41 [1] : vector<5x12xf32> to vector<5xf32>
    %62 = vector.shape_cast %61 : vector<5xf32> to vector<5x1xf32>
    %63 = tpu.reciprocal %62 {approx = true} : vector<5x1xf32> -> vector<5x1xf32>
    %64 = vector.broadcast %63 : vector<5x1xf32> to vector<5x12xf32>
    %65 = arith.mulf %60, %64 : vector<5x12xf32>
    %66 = tpu.iota {dimensions = array<i32: 0>} : vector<5x12xi32>
    %c2_i32 = arith.constant 2 : i32
    %67 = vector.broadcast %c2_i32 : i32 to vector<5x12xi32>
    %68 = arith.cmpi slt, %66, %67 : vector<5x12xi32>
    %c0_42 = arith.constant 0 : index
    %c0_43 = arith.constant 0 : index
    %69 = vector.load %arg7[%c0_42, %c0_43] : memref<5x12xf32, #tpu.memory_space<vmem>>, vector<5x12xf32>
    %70 = arith.select %68, %65, %69 : vector<5x12xi1>, vector<5x12xf32>
    %c0_44 = arith.constant 0 : index
    %c0_45 = arith.constant 0 : index
    %c0_46 = arith.constant 0 : index
    %71 = vector.load %arg8[%c0_44, %c0_45, %c0_46] : memref<1x5x12xf32, #tpu.memory_space<vmem>>, vector<1x5x12xf32>
    %72 = vector.shape_cast %71 : vector<1x5x12xf32> to vector<5x12xf32>
    %73 = vector.shape_cast %70 : vector<5x12xf32> to vector<1x5x12xf32>
    tpu.vector_store %arg8[%c0_44, %c0_45, %c0_46], %73 {strides = array<i32>} : memref<1x5x12xf32, #tpu.memory_space<vmem>>, vector<1x5x12xf32>,
    %c0_47 = arith.constant 0 : index
    %c0_48 = arith.constant 0 : index
    %74 = vector.load %arg9[%c0_47, %c0_48] : memref<5x32xf32, #tpu.memory_space<vmem>>, vector<5x32xf32>
    tpu.vector_store %arg9[%c0_47, %c0_48], %50 {strides = array<i32>} : memref<5x32xf32, #tpu.memory_space<vmem>>, vector<5x32xf32>,
    return
  }
  func.func @transform_0(%arg0: i32) -> (i32, i32, i32, i32) {
    %c0_i32 = arith.constant 0 : i32
    %c0_i32_0 = arith.constant 0 : i32
    %c0_i32_1 = arith.constant 0 : i32
    %c0_i32_2 = arith.constant 0 : i32
    return %arg0, %c0_i32, %c0_i32_0, %c0_i32_1 : i32, i32, i32, i32
  }
  func.func @transform_1(%arg0: i32) -> (i32, i32) {
    %c0_i32 = arith.constant 0 : i32
    %c0_i32_0 = arith.constant 0 : i32
    %c0_i32_1 = arith.constant 0 : i32
    return %c0_i32, %c0_i32_0 : i32, i32
  }
  func.func @transform_2(%arg0: i32) -> (i32, i32, i32) {
    %c0_i32 = arith.constant 0 : i32
    %c0_i32_0 = arith.constant 0 : i32
    %c0_i32_1 = arith.constant 0 : i32
    %c0_i32_2 = arith.constant 0 : i32
    return %c0_i32, %c0_i32_0, %c0_i32_1 : i32, i32, i32
  }
  func.func @transform_3(%arg0: i32) -> (i32, i32, i32) {
    %c0_i32 = arith.constant 0 : i32
    %c0_i32_0 = arith.constant 0 : i32
    %c0_i32_1 = arith.constant 0 : i32
    %c0_i32_2 = arith.constant 0 : i32
    return %c0_i32, %c0_i32_0, %c0_i32_1 : i32, i32, i32
  }
  func.func @transform_4(%arg0: i32) -> (i32, i32) {
    %c0_i32 = arith.constant 0 : i32
    %c0_i32_0 = arith.constant 0 : i32
    %c0_i32_1 = arith.constant 0 : i32
    return %c0_i32, %c0_i32_0 : i32, i32
  }
  func.func @transform_5(%arg0: i32) -> (i32, i32) {
    %c0_i32 = arith.constant 0 : i32
    %c0_i32_0 = arith.constant 0 : i32
    %c0_i32_1 = arith.constant 0 : i32
    return %c0_i32, %c0_i32_0 : i32, i32
  }
  func.func @transform_6(%arg0: i32) -> (i32, i32) {
    %c0_i32 = arith.constant 0 : i32
    %c0_i32_0 = arith.constant 0 : i32
    %c0_i32_1 = arith.constant 0 : i32
    return %c0_i32, %c0_i32_0 : i32, i32
  }
  func.func @transform_7(%arg0: i32) -> (i32, i32, i32) {
    %c0_i32 = arith.constant 0 : i32
    %c0_i32_0 = arith.constant 0 : i32
    %c0_i32_1 = arith.constant 0 : i32
    return %arg0, %c0_i32, %c0_i32_0 : i32, i32, i32
  }
  func.func @transform_8(%arg0: i32) -> (i32, i32) {
    %c0_i32 = arith.constant 0 : i32
    %c0_i32_0 = arith.constant 0 : i32
    %c0_i32_1 = arith.constant 0 : i32
    return %c0_i32, %c0_i32_0 : i32, i32
  }
}

</mosaic_0001>

<bundles_post_ra>
// kernel: char_rnn1_forward.1
= control target key start
LH: loop header
LB: loop body
LE: loop exit
PB: predicated region body
PF: predicated region fallthrough
CT: control target
= control target key end

     0   :  { %s926_s27 = smov 0   ;;  %s1043_s0 = inlined_call_operand.vmem [shape: f32[8,3,5,32], index: 0, kind: input, shape index: {}]   ;;  %s1044_s1 = inlined_call_operand.vmem [shape: f32[5,32], index: 1, kind: input, shape index: {}]   ;;  %s1045_s2 = inlined_call_operand.vmem [shape: f32[3,32,32], index: 2, kind: input, shape index: {}]   ;;  %s1046_s3 = inlined_call_operand.vmem [shape: f32[3,1,32], index: 3, kind: input, shape index: {}]   ;;  %s1047_s4 = inlined_call_operand.vmem [shape: f32[32,12], index: 4, kind: input, shape index: {}]   ;;  %s1048_s5 = inlined_call_operand.vmem [shape: f32[1,12], index: 5, kind: input, shape index: {}]   ;;  %s1049_s6 = inlined_call_operand.vmem [shape: f32[5,12], index: 6, kind: input, shape index: {}]   ;;  %s1050_s7 = inlined_call_operand.vmem [shape: f32[8,5,12], index: 7, kind: output, shape index: {0}]   ;;  %s1051_s8 = inlined_call_operand.vmem [shape: f32[5,32], index: 8, kind: output, shape index: {1}]  }
   0x1 LB: > { %s750_s28 = sadd.s32 4294967295, %s877_s27   ;;  %p754_p0 = scmp.ge.s32.totalorder %s877_s27, 1  ;;  %s877_s27 = sphi %s926_s27, %s19_s27  }
   0x2   : > { %p260_p1 = scmp.lt.s32.totalorder %s877_s27, 9 }
   0x4   : > { %p261_p2 = pnand %p754_p0, %p260_p1 }
   0x5   : > { %p293_p3 = scmp.lt.s32.totalorder (!%p261_p2), %s750_s28, 7  ;;  %p757_p4 = scmp.ne.s32.totalorder (!%p261_p2), %s750_s28, 0 }
   0x6   : > { %264 = sbr.rel (%p261_p2) target bundleno = 788 (0x314), region = 48 }
   0xb   : > { %s294_s29 = scalar_select %p293_p3, %s750_s28, 7 }
   0xc   : > { %305 = sbr.rel (%p757_p4) target bundleno = 19 (0x13), region = 52 }
   0xd   : > { %s846_s30 = smul.u32 24, %s294_s29  ;;  %s756_s9 = sshll.u32 %s294_s29, 3 }
   0xe   : > { %s937_s12 = scalar_lea.vmem %s1050_s7, %s756_s9 }
   0xf   : > { %s942_s15 = scalar_lea.vmem %s1043_s0, %s846_s30 }
  0x11   : > { %v306_v0 = vld [vmem:[%s1044_s1] sm:$0x1f]  ;;  %vm307_vm0 = vcmask 258048  }
  0x12   : > { %308 = vst.msk [vmem:[%s1051_s8] sm:$0x1f] %vm307_vm0, %v306_v0 }
  0x13 PF: > { %v313_v1 = vld [vmem:[%s1045_s2 + $0x18] sm:$0xff]  ;;  %v879_v2 = vmov 0.0   ;;  %v312_v3 = vld [vmem:[%s1045_s2 + $0x10] sm:$0xff]  ;;  %vm880_vm1 = vmmov 0   ;;  %v311_v6 = vld [vmem:[%s1045_s2 + $0x8] sm:$0xff]  ;;  %vm321_vm2 = vcmask 261120   ;;  %v683_v62 = vlaneseq }
  0x14   : > { %802 = vmatprep.subr.mxu0 %v879_v2  ;;  %810 = vmatprep.mubr.msk.f32.mxu0 %vm880_vm1, %v879_v2  ;;  %v763_v4 = vld [vmem:[%s1045_s2 + $0x38] sm:$0xff]  ;;  %v762_v5 = vld [vmem:[%s1045_s2 + $0x30] sm:$0xff]  ;;  %v761_v7 = vld [vmem:[%s1045_s2 + $0x28] sm:$0xff]  ;;  %vm689_vm3 = vcmask 258048   ;;  %vm671_vm4 = vcmask 94208  }
  0x15   : > { %803 = vmatpush3.msra.mxu0 %v313_v1  ;;  %813 = vmatprep.subr.mxu1 %v879_v2  ;;  %v310_v8 = vld [vmem:[%s1045_s2] sm:$0xff]  ;;  %v770_v11 = vld [vmem:[%s1045_s2 + $0x58] sm:$0xff]  ;;  %v769_v12 = vld [vmem:[%s1045_s2 + $0x50] sm:$0xff]  ;;  %v684_v63 = vshrl.u32 %v683_v62, 7 }
  0x16   : > { %804 = vmatprep.subr.mxu0 %v879_v2  ;;  %814 = vmatpush3.msra.mxu1 %v763_v4  ;;  %v760_v10 = vld [vmem:[%s1045_s2 + $0x20] sm:$0xff]  ;;  %v768_v13 = vld [vmem:[%s1045_s2 + $0x48] sm:$0xff]  ;;  %v590_v15 = vld [vmem:[%s1047_s4 + $0x18] sm:$0xff] }
  0x17   : > { %805 = vmatpush3.msra.mxu0 %v312_v3  ;;  %815 = vmatprep.subr.mxu1 %v879_v2  ;;  %v767_v14 = vld [vmem:[%s1045_s2 + $0x40] sm:$0xff]  ;;  %v589_v16 = vld [vmem:[%s1047_s4 + $0x10] sm:$0xff]  ;;  %v588_v17 = vld [vmem:[%s1047_s4 + $0x8] sm:$0xff]  ;;  %vm685_vm5 = vcmp.lt.s32.totalorder %v684_v63, 2 }
  0x18   : > { %806 = vmatprep.subr.mxu0 %v879_v2  ;;  %816 = vmatpush3.msra.mxu1 %v762_v5  ;;  %v587_v18 = vld [vmem:[%s1047_s4] sm:$0xff]  ;;  %v775_v28 = vld [vmem:[%s942_s15 + $0x8] sm:$0x1f]  ;;  %v777_v42 = vld [vmem:[%s942_s15 + $0x10] sm:$0x1f] }
  0x19   : > { %807 = vmatpush3.msra.mxu0 %v311_v6  ;;  %v975_v9 = vld [vmem:[%s1051_s8] sm:$0x1f]  ;;  %817 = vmatprep.subr.mxu1 %v879_v2 }
  0x1a   : > { %808 = vmatprep.subr.mxu0 %v879_v2  ;;  %818 = vmatpush3.msra.mxu1 %v761_v7  ;;  %v758_v19 = vld [vmem:[%s1046_s3] ss:$0 sm:$0xff]  ;;  %v765_v22 = vld [vmem:[%s1046_s3 + $0x1] ss:$0 sm:$0xff]  ;;  %v772_v38 = vld [vmem:[%s1046_s3 + $0x2] ss:$0 sm:$0xff] }
  0x1b   : > { %809 = vmatpush3.msra.mxu0 %v310_v8  ;;  %819 = vmatprep.subr.mxu1 %v879_v2  ;;  %v561_v21 = vld [vmem:[%s942_s15] sm:$0x1f] }
  0x1c   : > { %811 = vmatmul.mubr.msk.f32.vlgmr.msra.gmra.mxu0 %vm321_vm2, %v975_v9  ;;  %820 = vmatpush3.msra.mxu1 %v760_v10  ;;  %v778_v51 = vld [vmem:[%s1048_s5] ss:$0 sm:$0xff] }
  0x1d   : > { %821 = vmatprep.mubr.msk.f32.mxu1 %vm880_vm1, %v879_v2  ;;  %824 = vmatprep.subr.mxu0 %v879_v2  ;;  %v686_v1 = vld [vmem:[%s1049_s6] sm:$0x1f] }
  0x1e   : > { %822 = vmatmul.mubr.msk.f32.vlgmr.msra.gmra.mxu1 %vm321_vm2, %v975_v9  ;;  %825 = vmatpush3.msra.mxu0 %v770_v11 }
  0x1f   : > { %826 = vmatprep.subr.mxu0 %v879_v2  ;;  %832 = vmatprep.mubr.msk.f32.mxu0 %vm880_vm1, %v879_v2 }
  0x20   : > { %827 = vmatpush3.msra.mxu0 %v769_v12  ;;  %835 = vmatprep.subr.mxu1 %v879_v2 }
  0x21   : > { %828 = vmatprep.subr.mxu0 %v879_v2  ;;  %843 = vmatprep.mubr.msk.f32.mxu1 %vm880_vm1, %v879_v2 }
  0x22   : > { %829 = vmatpush3.msra.mxu0 %v768_v13  ;;  %836 = vmatpush3.msra.mxu1 %v590_v15 }
  0x23   : > { %830 = vmatprep.subr.mxu0 %v879_v2  ;;  %837 = vmatprep.subr.mxu1 %v879_v2 }
  0x24   : > { %831 = vmatpush3.msra.mxu0 %v767_v14  ;;  %838 = vmatpush3.msra.mxu1 %v589_v16 }
  0x25   : > { %833 = vmatmul.mubr.msk.f32.vlgmr.msra.gmra.mxu0 %vm321_vm2, %v975_v9  ;;  %839 = vmatprep.subr.mxu1 %v879_v2 }
  0x26   : > { %840 = vmatpush3.msra.mxu1 %v588_v17 }
  0x27   : > { %841 = vmatprep.subr.mxu1 %v879_v2 }
  0x28   : > { %842 = vmatpush3.msra.mxu1 %v587_v18 }
  0xdc   : > { %v391_v20 = vpop.f32.mrf.mxu0 }
  0xdd   : > { %v392_v23 = vadd.f32 %v758_v19, %v391_v20 }
  0xde   : > { %v812_v24 = vpop.f32.mrf.mxu0  ;;  %v474_v25 = vpop.f32.mrf.mxu1 }
  0xdf   : > { %v562_v26 = vadd.f32 %v561_v21, %v392_v23  ;;  %v475_v27 = vadd.f32 %v765_v22, %v474_v25 }
  0xe0   : > { %v823_v29 = vpop.f32.mrf.mxu1 }
  0xe1   : > { %v774_v30 = vmul.f32 -1.442695, %v562_v26  ;;  %v571_v31 = vadd.f32 %v775_v28, %v475_v27 }
  0xe3   : > { %857 = vpow2.f32 %v774_v30  ;;  %v776_v33 = vmul.f32 -1.442695, %v571_v31 }
  0xe5   : > { %v557_v32 = vpop.f32.mrf.mxu0  ;;  %859 = vpow2.f32 %v776_v33 }
  0xe6   : > { %v558_v40 = vadd.f32 %v772_v38, %v557_v32 }
  0xe7   : > { %v834_v34 = vpop.f32.mrf.mxu0 }
  0xf0   : > { %v858_v35 = vpop.eup %857 }
  0xf1   : > { %v566_v36 = vadd.f32 1.0, %v858_v35 }
  0xf2   : > { %v860_v37 = vpop.eup %859 }
  0xf3   : > { %861 = vrcp.f32 %v566_v36  ;;  %v575_v39 = vadd.f32 1.0, %v860_v37 }
  0xf5   : > { %863 = vrcp.f32 %v575_v39 }
 0x100   : > { %v862_v41 = vpop.eup %861 }
 0x101   : > { %v580_v43 = vmul.f32 %v862_v41, %v558_v40 }
 0x102   : > { %v864_v45 = vpop.eup %863 }
 0x103   : > { %v581_v44 = vadd.f32 %v777_v42, %v580_v43  ;;  %v583_v46 = vsub.f32 1.0, %v864_v45  ;;  %v585_v49 = vmul.f32 %v864_v45, %v975_v9 }
 0x105   : > { %865 = vtanh.f32 %v581_v44 }
 0x112   : > { %v866_v47 = vpop.eup %865 }
 0x113   : > { %v584_v48 = vmul.f32 %v866_v47, %v583_v46 }
 0x115   : > { %v586_v50 = vadd.f32 %v585_v49, %v584_v48 }
 0x117   : > { %844 = vmatmul.mubr.msk.f32.vlgmr.msra.gmra.mxu1 %vm321_vm2, %v586_v50  ;;  %690 = vst.msk [vmem:[%s1051_s8] sm:$0x1f] %vm689_vm3, %v586_v50 }
 0x1d7   : > { %v667_v52 = vpop.f32.mrf.mxu1 }
 0x1d8   : > { %v668_v53 = vadd.f32 %v778_v51, %v667_v52 }
 0x1d9   : > { %v845_v54 = vpop.f32.mrf.mxu1 }
 0x1da   : > { %v672_v55 = vsel %vm671_vm4, %v668_v53, -inf }
 0x1db   : > { %673 = vmax.xlane.f32.xlu0 %v672_v55 }
 0x264   : > { %v674_v56 = vpop.xlane.xlu0 %673 }
 0x265   : > { %v675_v57 = vsub.f32 %v668_v53, %v674_v56 }
 0x267   : > { %v676_v58 = vmul.f32 1.442695, %v675_v57 }
 0x269   : > { %867 = vpow2.f32 %v676_v58 }
 0x276   : > { %v868_v59 = vpop.eup %867 }
 0x277   : > { %v678_v60 = vsel %vm671_vm4, %v868_v59, 0.0 }
 0x278   : > { %679 = vadd.xlane.f32.xlu0 %v678_v60 }
 0x301   : > { %v680_v61 = vpop.xlane.xlu0 %679 }
 0x302   : > { %869 = vrcp.f32 %v680_v61 }
 0x30f   : > { %v870_v0 = vpop.eup %869 }
 0x310   : > { %v682_v2 = vmul.f32 %v870_v0, %v868_v59 }
 0x312   : > { %v687_v3 = vsel %vm685_vm5, %v682_v2, %v686_v1 }
 0x313   : > { %688 = vst.msk [vmem:[%s937_s12] sm:$0x1f] %vm671_vm4, %v687_v3 }
 0x314 PF: > { %s19_s27 = sadd.s32 1, %s877_s27  }
 0x315   : > { %p16_p5 = scmp.ge.s32.totalorder %s19_s27, 10  }
 0x317   :  { %18 = sbr.rel (!%p16_p5) target bundleno = 1 (0x1), region = 96 }

</bundles_post_ra>
